<compile_context>
chip_gen: v7x
topology: tpu7x:2x2x1
jax: 0.10.0
libtpu: 0.0.40
codegen_flags: <defaults>
</compile_context>

<pallas_src>
import jax
import jax.numpy as jnp
from jax.experimental import pallas as pl
from jax.experimental.pallas import tpu as pltpu


def _round_up(n, m):
    return ((n + m - 1) // m) * m


def actor_kernel(x_ref,
                 w1_ref, b1_ref,
                 w2_ref, b2_ref,
                 w3_ref, b3_ref,
                 w4_ref, b4_ref,
                 o_ref):
    # bf16 operands into the MXU, f32 accumulation, f32 epilogue (VPU/EUP).
    x = x_ref[...].astype(jnp.bfloat16)

    h = jnp.dot(x, w1_ref[...], preferred_element_type=jnp.float32) + b1_ref[...]
    h = jnp.maximum(h, 0.0)

    h = jnp.dot(h.astype(jnp.bfloat16), w2_ref[...],
                preferred_element_type=jnp.float32) + b2_ref[...]
    h = jnp.maximum(h, 0.0)

    h = jnp.dot(h.astype(jnp.bfloat16), w3_ref[...],
                preferred_element_type=jnp.float32) + b3_ref[...]
    h = jnp.maximum(h, 0.0)

    h = jnp.dot(h.astype(jnp.bfloat16), w4_ref[...],
                preferred_element_type=jnp.float32) + b4_ref[...]
    o_ref[...] = jnp.tanh(h).astype(o_ref.dtype)


def actor_forward(x, params, *, block_m=256):
    """x: (batch, o+g) float32.  params: dict with bf16 transposed weights
    w1..w4 of shape (in, out) and f32 biases b1..b4 of shape (1, out)."""
    batch, in_dim = x.shape
    out_dim = params["w4"].shape[1]

    # Batch tile: multiple of 8 sublanes, capped so it fits v7x VMEM easily.
    bm = min(block_m, _round_up(max(batch, 1), 8))
    padded = _round_up(batch, bm)
    if padded != batch:
        x = jnp.pad(x, ((0, padded - batch), (0, 0)))

    grid = (padded // bm,)

    def pinned(arr):
        # Weights / biases: same block for every grid step -> stay VMEM-resident.
        return pl.BlockSpec(arr.shape, lambda i, _nd=arr.ndim: (0,) * _nd)

    weight_args = (params["w1"], params["b1"],
                   params["w2"], params["b2"],
                   params["w3"], params["b3"],
                   params["w4"], params["b4"])

    in_specs = [pl.BlockSpec((bm, in_dim), lambda i: (i, 0))]
    in_specs += [pinned(a) for a in weight_args]

    out = pl.pallas_call(
        actor_kernel,
        out_shape=jax.ShapeDtypeStruct((padded, out_dim), jnp.float32),
        grid=grid,
        in_specs=in_specs,
        # TODO(synk): output is (bm, 4) -> masked lane stores; a lane-padded
        # (bm, 128) layout would be faster but the consumer expects (batch, 4).
        out_specs=pl.BlockSpec((bm, out_dim), lambda i: (i, 0)),
        compiler_params=pltpu.CompilerParams(
            dimension_semantics=("parallel",),   # v7x: shard batch tiles over 2 TCs
            vmem_limit_bytes=64 << 20,
        ),
    )(x, *weight_args)

    return out[:batch]


def init_actor_params(key, in_dim, hidden=256, out_dim=4):
    """PyTorch nn.Linear default init (U[-1/sqrt(fan_in), 1/sqrt(fan_in)]).
    Weights stored transposed (in, out) and cast to bf16 for the MXU;
    biases kept f32 as (1, out)."""
    dims = [(in_dim, hidden), (hidden, hidden), (hidden, hidden), (hidden, out_dim)]
    params = {}
    keys = jax.random.split(key, 2 * len(dims))
    for idx, (fan_in, fan_out) in enumerate(dims):
        bound = 1.0 / jnp.sqrt(jnp.float32(fan_in))
        w = jax.random.uniform(keys[2 * idx], (fan_in, fan_out),
                               minval=-bound, maxval=bound, dtype=jnp.float32)
        b = jax.random.uniform(keys[2 * idx + 1], (1, fan_out),
                               minval=-bound, maxval=bound, dtype=jnp.float32)
        params[f"w{idx + 1}"] = w.astype(jnp.bfloat16)
        params[f"b{idx + 1}"] = b
    return params


def actor_reference(x, params):
    """Pure-JAX reference mirroring the kernel math (bf16 operands, f32 acc)."""
    def lin(h, w, b):
        return jnp.dot(h.astype(jnp.bfloat16), w,
                       preferred_element_type=jnp.float32) + b
    h = jnp.maximum(lin(x, params["w1"], params["b1"]), 0.0)
    h = jnp.maximum(lin(h, params["w2"], params["b2"]), 0.0)
    h = jnp.maximum(lin(h, params["w3"], params["b3"]), 0.0)
    return jnp.tanh(lin(h, params["w4"], params["b4"]))


if __name__ == "__main__":
    # dims = {'o': 10, 'g': 6}  ->  in_features = 16, out = 4 actions
    dims_o, dims_g = 10, 6
    in_dim = dims_o + dims_g

    key = jax.random.PRNGKey(0)
    k_params, k_x1, k_x2 = jax.random.split(key, 3)
    params = init_actor_params(k_params, in_dim)

    # Case 1: tiny rollout batch (single 8-row tile, one grid step).
    x_small = jax.random.normal(k_x1, (8, in_dim), dtype=jnp.float32)
    out_small = jax.block_until_ready(actor_forward(x_small, params))
    ref_small = actor_reference(x_small, params)
    assert out_small.shape == (8, 4)
    assert jnp.allclose(out_small, ref_small, atol=1e-2, rtol=1e-2), \
        "mismatch vs reference (small batch)"

    # Case 2: larger batch exercising the batch grid (multiple pipelined tiles
    # + zero-padding of the ragged tail, sliced off in the wrapper).
    x_big = jax.random.normal(k_x2, (200, in_dim), dtype=jnp.float32)
    out_big = jax.block_until_ready(actor_forward(x_big, params, block_m=64))
    ref_big = actor_reference(x_big, params)
    assert out_big.shape == (200, 4)
    assert jnp.allclose(out_big, ref_big, atol=1e-2, rtol=1e-2), \
        "mismatch vs reference (batched grid)"

    print("KERNEL_OK")
</pallas_src>

<mosaic_0001>
module attributes {stable_mosaic.version = 11 : i64} {
  func.func @actor_kernel(%arg0: i32, %arg1: memref<8x16xf32, #tpu.memory_space<vmem>>, %arg2: memref<16x256xbf16, #tpu.memory_space<vmem>>, %arg3: memref<1x256xf32, #tpu.memory_space<vmem>>, %arg4: memref<256x256xbf16, #tpu.memory_space<vmem>>, %arg5: memref<1x256xf32, #tpu.memory_space<vmem>>, %arg6: memref<256x256xbf16, #tpu.memory_space<vmem>>, %arg7: memref<1x256xf32, #tpu.memory_space<vmem>>, %arg8: memref<256x4xbf16, #tpu.memory_space<vmem>>, %arg9: memref<1x4xf32, #tpu.memory_space<vmem>>, %arg10: memref<8x4xf32, #tpu.memory_space<vmem>>) attributes {dimension_semantics = [#tpu.dimension_semantics<parallel>], iteration_bounds = array<i64: 1>, scalar_prefetch = 0 : i64, scratch_operands = 0 : i64, tpu.core_type = #tpu.core_type<tc>, window_params = [{transform_indices = @transform_0, window_bounds = array<i64: 8, 16>}, {pipeline_mode = #tpu.pipeline_mode<synchronous>, transform_indices = @transform_1, window_bounds = array<i64: 16, 256>}, {pipeline_mode = #tpu.pipeline_mode<synchronous>, transform_indices = @transform_2, window_bounds = array<i64: 1, 256>}, {pipeline_mode = #tpu.pipeline_mode<synchronous>, transform_indices = @transform_3, window_bounds = array<i64: 256, 256>}, {pipeline_mode = #tpu.pipeline_mode<synchronous>, transform_indices = @transform_4, window_bounds = array<i64: 1, 256>}, {pipeline_mode = #tpu.pipeline_mode<synchronous>, transform_indices = @transform_5, window_bounds = array<i64: 256, 256>}, {pipeline_mode = #tpu.pipeline_mode<synchronous>, transform_indices = @transform_6, window_bounds = array<i64: 1, 256>}, {pipeline_mode = #tpu.pipeline_mode<synchronous>, transform_indices = @transform_7, window_bounds = array<i64: 256, 4>}, {pipeline_mode = #tpu.pipeline_mode<synchronous>, transform_indices = @transform_8, window_bounds = array<i64: 1, 4>}, {transform_indices = @transform_9, window_bounds = array<i64: 8, 4>}]} {
    %c0 = arith.constant 0 : index
    %c0_0 = arith.constant 0 : index
    %0 = vector.load %arg1[%c0, %c0_0] : memref<8x16xf32, #tpu.memory_space<vmem>>, vector<8x16xf32>
    %1 = arith.truncf %0 : vector<8x16xf32> to vector<8x16xbf16>
    %c0_1 = arith.constant 0 : index
    %c0_2 = arith.constant 0 : index
    %2 = vector.load %arg2[%c0_1, %c0_2] : memref<16x256xbf16, #tpu.memory_space<vmem>>, vector<16x256xbf16>
    %cst = arith.constant dense<0.000000e+00> : vector<8x256xf32>
    %3 = tpu.matmul %1, %2, %cst {dimension_numbers = #tpu.dot_dimension_numbers<[1], [0], [0], [1], [0, 0, 1, 1], [], []>} : vector<8x16xbf16>, vector<16x256xbf16>, vector<8x256xf32> -> vector<8x256xf32>
    %c0_3 = arith.constant 0 : index
    %c0_4 = arith.constant 0 : index
    %4 = vector.load %arg3[%c0_3, %c0_4] : memref<1x256xf32, #tpu.memory_space<vmem>>, vector<1x256xf32>
    %5 = vector.broadcast %4 : vector<1x256xf32> to vector<8x256xf32>
    %6 = arith.addf %3, %5 : vector<8x256xf32>
    %cst_5 = arith.constant 0.000000e+00 : f32
    %7 = vector.broadcast %cst_5 : f32 to vector<8x256xf32>
    %8 = arith.maximumf %6, %7 : vector<8x256xf32>
    %9 = arith.truncf %8 : vector<8x256xf32> to vector<8x256xbf16>
    %c0_6 = arith.constant 0 : index
    %c0_7 = arith.constant 0 : index
    %10 = vector.load %arg4[%c0_6, %c0_7] : memref<256x256xbf16, #tpu.memory_space<vmem>>, vector<256x256xbf16>
    %cst_8 = arith.constant dense<0.000000e+00> : vector<8x256xf32>
    %11 = tpu.matmul %9, %10, %cst_8 {dimension_numbers = #tpu.dot_dimension_numbers<[1], [0], [0], [1], [0, 0, 1, 1], [], []>} : vector<8x256xbf16>, vector<256x256xbf16>, vector<8x256xf32> -> vector<8x256xf32>
    %c0_9 = arith.constant 0 : index
    %c0_10 = arith.constant 0 : index
    %12 = vector.load %arg5[%c0_9, %c0_10] : memref<1x256xf32, #tpu.memory_space<vmem>>, vector<1x256xf32>
    %13 = vector.broadcast %12 : vector<1x256xf32> to vector<8x256xf32>
    %14 = arith.addf %11, %13 : vector<8x256xf32>
    %cst_11 = arith.constant 0.000000e+00 : f32
    %15 = vector.broadcast %cst_11 : f32 to vector<8x256xf32>
    %16 = arith.maximumf %14, %15 : vector<8x256xf32>
    %17 = arith.truncf %16 : vector<8x256xf32> to vector<8x256xbf16>
    %c0_12 = arith.constant 0 : index
    %c0_13 = arith.constant 0 : index
    %18 = vector.load %arg6[%c0_12, %c0_13] : memref<256x256xbf16, #tpu.memory_space<vmem>>, vector<256x256xbf16>
    %cst_14 = arith.constant dense<0.000000e+00> : vector<8x256xf32>
    %19 = tpu.matmul %17, %18, %cst_14 {dimension_numbers = #tpu.dot_dimension_numbers<[1], [0], [0], [1], [0, 0, 1, 1], [], []>} : vector<8x256xbf16>, vector<256x256xbf16>, vector<8x256xf32> -> vector<8x256xf32>
    %c0_15 = arith.constant 0 : index
    %c0_16 = arith.constant 0 : index
    %20 = vector.load %arg7[%c0_15, %c0_16] : memref<1x256xf32, #tpu.memory_space<vmem>>, vector<1x256xf32>
    %21 = vector.broadcast %20 : vector<1x256xf32> to vector<8x256xf32>
    %22 = arith.addf %19, %21 : vector<8x256xf32>
    %cst_17 = arith.constant 0.000000e+00 : f32
    %23 = vector.broadcast %cst_17 : f32 to vector<8x256xf32>
    %24 = arith.maximumf %22, %23 : vector<8x256xf32>
    %25 = arith.truncf %24 : vector<8x256xf32> to vector<8x256xbf16>
    %c0_18 = arith.constant 0 : index
    %c0_19 = arith.constant 0 : index
    %26 = vector.load %arg8[%c0_18, %c0_19] : memref<256x4xbf16, #tpu.memory_space<vmem>>, vector<256x4xbf16>
    %cst_20 = arith.constant dense<0.000000e+00> : vector<8x4xf32>
    %27 = tpu.matmul %25, %26, %cst_20 {dimension_numbers = #tpu.dot_dimension_numbers<[1], [0], [0], [1], [0, 0, 1, 1], [], []>} : vector<8x256xbf16>, vector<256x4xbf16>, vector<8x4xf32> -> vector<8x4xf32>
    %c0_21 = arith.constant 0 : index
    %c0_22 = arith.constant 0 : index
    %28 = vector.load %arg9[%c0_21, %c0_22] : memref<1x4xf32, #tpu.memory_space<vmem>>, vector<1x4xf32>
    %29 = vector.broadcast %28 : vector<1x4xf32> to vector<8x4xf32>
    %30 = arith.addf %27, %29 : vector<8x4xf32>
    %31 = math.tanh %30 : vector<8x4xf32>
    %c0_23 = arith.constant 0 : index
    %c0_24 = arith.constant 0 : index
    %32 = vector.load %arg10[%c0_23, %c0_24] : memref<8x4xf32, #tpu.memory_space<vmem>>, vector<8x4xf32>
    tpu.vector_store %arg10[%c0_23, %c0_24], %31 {strides = array<i32>} : memref<8x4xf32, #tpu.memory_space<vmem>>, vector<8x4xf32>,
    return
  }
  func.func @transform_0(%arg0: i32) -> (i32, i32) {
    %c0_i32 = arith.constant 0 : i32
    %c0_i32_0 = arith.constant 0 : i32
    return %arg0, %c0_i32 : i32, i32
  }
  func.func @transform_1(%arg0: i32) -> (i32, i32) {
    %c0_i32 = arith.constant 0 : i32
    %c0_i32_0 = arith.constant 0 : i32
    %c0_i32_1 = arith.constant 0 : i32
    return %c0_i32, %c0_i32_0 : i32, i32
  }
  func.func @transform_2(%arg0: i32) -> (i32, i32) {
    %c0_i32 = arith.constant 0 : i32
    %c0_i32_0 = arith.constant 0 : i32
    %c0_i32_1 = arith.constant 0 : i32
    return %c0_i32, %c0_i32_0 : i32, i32
  }
  func.func @transform_3(%arg0: i32) -> (i32, i32) {
    %c0_i32 = arith.constant 0 : i32
    %c0_i32_0 = arith.constant 0 : i32
    %c0_i32_1 = arith.constant 0 : i32
    return %c0_i32, %c0_i32_0 : i32, i32
  }
  func.func @transform_4(%arg0: i32) -> (i32, i32) {
    %c0_i32 = arith.constant 0 : i32
    %c0_i32_0 = arith.constant 0 : i32
    %c0_i32_1 = arith.constant 0 : i32
    return %c0_i32, %c0_i32_0 : i32, i32
  }
  func.func @transform_5(%arg0: i32) -> (i32, i32) {
    %c0_i32 = arith.constant 0 : i32
    %c0_i32_0 = arith.constant 0 : i32
    %c0_i32_1 = arith.constant 0 : i32
    return %c0_i32, %c0_i32_0 : i32, i32
  }
  func.func @transform_6(%arg0: i32) -> (i32, i32) {
    %c0_i32 = arith.constant 0 : i32
    %c0_i32_0 = arith.constant 0 : i32
    %c0_i32_1 = arith.constant 0 : i32
    return %c0_i32, %c0_i32_0 : i32, i32
  }
  func.func @transform_7(%arg0: i32) -> (i32, i32) {
    %c0_i32 = arith.constant 0 : i32
    %c0_i32_0 = arith.constant 0 : i32
    %c0_i32_1 = arith.constant 0 : i32
    return %c0_i32, %c0_i32_0 : i32, i32
  }
  func.func @transform_8(%arg0: i32) -> (i32, i32) {
    %c0_i32 = arith.constant 0 : i32
    %c0_i32_0 = arith.constant 0 : i32
    %c0_i32_1 = arith.constant 0 : i32
    return %c0_i32, %c0_i32_0 : i32, i32
  }
  func.func @transform_9(%arg0: i32) -> (i32, i32) {
    %c0_i32 = arith.constant 0 : i32
    %c0_i32_0 = arith.constant 0 : i32
    return %arg0, %c0_i32 : i32, i32
  }
}

</mosaic_0001>

<bundles_post_ra>
// kernel: tpu_custom_call.1
= control target key start
LH: loop header
LB: loop body
LE: loop exit
PB: predicated region body
PF: predicated region fallthrough
CT: control target
= control target key end

     0   :  { %14 = vsyncpa [#allocation3], 0  ;;  %s1590_s0 = inlined_call_operand.hbm [shape: f32[8,16], index: 0, kind: input, shape index: {}]   ;;  %s1591_s1 = inlined_call_operand.hbm [shape: bf16[16,256], index: 1, kind: input, shape index: {}]   ;;  %s1592_s2 = inlined_call_operand.hbm [shape: f32[1,256], index: 2, kind: input, shape index: {}]   ;;  %s1593_s3 = inlined_call_operand.hbm [shape: bf16[256,256], index: 3, kind: input, shape index: {}]   ;;  %s1594_s4 = inlined_call_operand.hbm [shape: f32[1,256], index: 4, kind: input, shape index: {}]   ;;  %s1595_s5 = inlined_call_operand.hbm [shape: bf16[256,256], index: 5, kind: input, shape index: {}]   ;;  %s1596_s6 = inlined_call_operand.hbm [shape: f32[1,256], index: 6, kind: input, shape index: {}]   ;;  %s1597_s7 = inlined_call_operand.hbm [shape: bf16[256,4], index: 7, kind: input, shape index: {}]   ;;  %s1598_s8 = inlined_call_operand.hbm [shape: f32[1,4], index: 8, kind: input, shape index: {}]   ;;  %s1599_s9 = inlined_call_operand.hbm [shape: f32[8,4], index: 9, kind: output, shape index: {}]  }
   0x1   :  { %15 = vsyncpa [#allocation6], 0 }
   0x2   :  { %16 = vsyncpa [#allocation9], 0 }
   0x3   :  { %17 = vsyncpa [#allocation12], 0 }
   0x4   :  { %18 = vsyncpa [#allocation15], 0 }
   0x5   :  { %19 = vsyncpa [#allocation4], 0  ;;  %s1386_s30 = smov [#allocation5]   ;;  %s1154_s13 = scalar_lea.hbm %s1591_s1, 256 }
   0x6   :  { %s35_s10 = sshll.u32 %s1386_s30, 4  ;;  %p1155_p0 = scmp.ne.s32.totalorder %s1591_s1, %s1154_s13  ;;  %s36_s10 = int_to_ptr.vmem [resolvable:$true] %s35_s10 }
   0x7   :  { %p1158_p1 = scmp.lt.u32.totalorder %s1154_s13, %s1591_s1 }
   0x9   :  { %p1160_p2 = pnand %p1158_p1, %p1155_p0 }
   0xb   :  { %1163 = shalt.err (!%p1160_p2)
}
   0xc   :  { %s1164_s18 = scalar_lea.vmem %s36_s10, 256  ;;  %p1169_p4 = scmp.lt.s32.totalorder %s36_s10, %s36_s10 }
   0xd   :  { %p1165_p3 = scmp.ne.s32.totalorder %s36_s10, %s1164_s18  ;;  %p1170_p5 = scmp.lt.s32.totalorder %s1164_s18, %s1164_s18 }
   0xf   :  { %p1171_p6 = por %p1170_p5, %p1169_p4 }
  0x11   :  { %p1172_p7 = pnand %p1171_p6, %p1165_p3 }
  0x13   :  { %1175 = shalt.err (!%p1172_p7)
}
  0x14   :  { %s1387_s19 = smov 128   ;;  %s1388_s20 = smov 8  }
  0x15   :  { %41 = dma.hbm_to_vmem [thread:$0]  %s1591_s1, 256, %s36_s10, [#allocation6], %s1387_s19, %s1387_s19, %s1388_s20  }
  0x16   :  { %s1389_s23 = smov [#allocation8]   ;;  %s1390_s25 = smov [#allocation11]  }
  0x17   :  { %s57_s24 = sshll.u32 %s1389_s23, 4  ;;  %s79_s26 = sshll.u32 %s1390_s25, 4  ;;  %s58_s24 = int_to_ptr.vmem [resolvable:$true] %s57_s24  ;;  %s80_s26 = int_to_ptr.vmem [resolvable:$true] %s79_s26 }
  0x18   :  { %s1176_s29 = scalar_lea.hbm %s1593_s3, 4096 }
  0x19   :  { %p1177_p8 = scmp.ne.s32.totalorder %s1593_s3, %s1176_s29  ;;  %p1180_p9 = scmp.lt.u32.totalorder %s1176_s29, %s1593_s3 }
  0x1b   :  { %p1182_p10 = pnand %p1180_p9, %p1177_p8 }
  0x1d   :  { %1185 = shalt.err (!%p1182_p10)
}
  0x1e   :  { %s1186_s1 = scalar_lea.vmem %s58_s24, 4096  ;;  %p1191_p12 = scmp.lt.s32.totalorder %s58_s24, %s58_s24 }
  0x1f   :  { %p1187_p11 = scmp.ne.s32.totalorder %s58_s24, %s1186_s1  ;;  %p1192_p13 = scmp.lt.s32.totalorder %s1186_s1, %s1186_s1 }
  0x21   :  { %p1193_p0 = por %p1192_p13, %p1191_p12 }
  0x23   :  { %p1194_p1 = pnand %p1193_p0, %p1187_p11 }
  0x25   :  { %1197 = shalt.err (!%p1194_p1)
}
  0x26   :  { %63 = dma.hbm_to_vmem [thread:$0]  %s1593_s3, 4096, %s58_s24, [#allocation9], %s1387_s19, %s1387_s19, %s1388_s20  }
  0x27   :  { %s1198_s17 = scalar_lea.hbm %s1595_s5, 4096 }
  0x28   :  { %p1199_p2 = scmp.ne.s32.totalorder %s1595_s5, %s1198_s17  ;;  %p1202_p3 = scmp.lt.u32.totalorder %s1198_s17, %s1595_s5 }
  0x2a   :  { %p1204_p4 = pnand %p1202_p3, %p1199_p2 }
  0x2c   :  { %1207 = shalt.err (!%p1204_p4)
}
  0x2d   :  { %s1208_s25 = scalar_lea.vmem %s80_s26, 4096  ;;  %p1213_p6 = scmp.lt.s32.totalorder %s80_s26, %s80_s26 }
  0x2e   :  { %p1209_p5 = scmp.ne.s32.totalorder %s80_s26, %s1208_s25  ;;  %p1214_p7 = scmp.lt.s32.totalorder %s1208_s25, %s1208_s25 }
  0x30   :  { %p1215_p8 = por %p1214_p7, %p1213_p6 }
  0x32   :  { %p1216_p9 = pnand %p1215_p8, %p1209_p5 }
  0x34   :  { %1219 = shalt.err (!%p1216_p9)
}
  0x35   :  { %85 = dma.hbm_to_vmem [thread:$0]  %s1595_s5, 4096, %s80_s26, [#allocation12], %s1387_s19, %s1387_s19, %s1388_s20  }
  0x36   :  { %s1391_s27 = smov [#allocation14]   ;;  %s1220_s11 = scalar_lea.hbm %s1597_s7, 2048 }
  0x37   :  { %s101_s28 = sshll.u32 %s1391_s27, 4  ;;  %p1221_p10 = scmp.ne.s32.totalorder %s1597_s7, %s1220_s11  ;;  %s102_s28 = int_to_ptr.vmem [resolvable:$true] %s101_s28 }
  0x38   :  { %p1224_p11 = scmp.lt.u32.totalorder %s1220_s11, %s1597_s7 }
  0x3a   :  { %p1226_p12 = pnand %p1224_p11, %p1221_p10 }
  0x3c   :  { %1229 = shalt.err (!%p1226_p12)
}
  0x3d   :  { %s1230_s14 = scalar_lea.vmem %s102_s28, 2048  ;;  %p1235_p0 = scmp.lt.s32.totalorder %s102_s28, %s102_s28 }
  0x3e   :  { %p1231_p13 = scmp.ne.s32.totalorder %s102_s28, %s1230_s14  ;;  %p1236_p1 = scmp.lt.s32.totalorder %s1230_s14, %s1230_s14 }
  0x40   :  { %p1237_p2 = por %p1236_p1, %p1235_p0 }
  0x42   :  { %p1238_p3 = pnand %p1237_p2, %p1231_p13 }
  0x44   :  { %1241 = shalt.err (!%p1238_p3)
}
  0x45   :  { %s1392_s5 = smov 64   ;;  %s1393_s19 = smov 4  }
  0x46   :  { %107 = dma.hbm_to_vmem [thread:$0]  %s1597_s7, 2048, %s102_s28, [#allocation15], %s1392_s5, %s1392_s5, %s1393_s19  }
  0x47   :  { %s1394_s15 = smov [#allocation2]   ;;  %s1395_s17 = smov [#allocation7]  }
  0x48   :  { %s26_s16 = sshll.u32 %s1394_s15, 4  ;;  %s48_s18 = sshll.u32 %s1395_s17, 4  ;;  %s27_s16 = int_to_ptr.vmem [resolvable:$true] %s26_s16  ;;  %s49_s18 = int_to_ptr.vmem [resolvable:$true] %s48_s18 }
  0x49   :  { %s1242_s23 = scalar_lea.hbm %s1590_s0, 128 }
  0x4a   :  { %p1243_p4 = scmp.ne.s32.totalorder %s1590_s0, %s1242_s23  ;;  %p1246_p5 = scmp.lt.u32.totalorder %s1242_s23, %s1590_s0 }
  0x4c   :  { %p1248_p6 = pnand %p1246_p5, %p1243_p4 }
  0x4e   :  { %1251 = shalt.err (!%p1248_p6)
}
  0x4f   :  { %s1252_s7 = scalar_lea.vmem %s27_s16, 128  ;;  %p1257_p8 = scmp.lt.s32.totalorder %s27_s16, %s27_s16 }
  0x50   :  { %p1253_p7 = scmp.ne.s32.totalorder %s27_s16, %s1252_s7  ;;  %p1258_p9 = scmp.lt.s32.totalorder %s1252_s7, %s1252_s7 }
  0x52   :  { %p1259_p10 = por %p1258_p9, %p1257_p8 }
  0x54   :  { %p1260_p11 = pnand %p1259_p10, %p1253_p7 }
  0x56   :  { %1263 = shalt.err (!%p1260_p11)
}
  0x57   :  { %29 = dma.hbm_to_vmem [thread:$0]  %s1590_s0, 128, %s27_s16, [#allocation3]  }
  0x58   :  { %s1264_s12 = scalar_lea.hbm %s1592_s2, 32 }
  0x59   :  { %p1265_p12 = scmp.ne.s32.totalorder %s1592_s2, %s1264_s12  ;;  %p1268_p13 = scmp.lt.u32.totalorder %s1264_s12, %s1592_s2 }
  0x5b   :  { %p1270_p0 = pnand %p1268_p13, %p1265_p12 }
  0x5d   :  { %1273 = shalt.err (!%p1270_p0)
}
  0x5e   :  { %s1274_s5 = scalar_lea.vmem %s49_s18, 32  ;;  %p1279_p2 = scmp.lt.s32.totalorder %s49_s18, %s49_s18 }
  0x5f   :  { %p1275_p1 = scmp.ne.s32.totalorder %s49_s18, %s1274_s5  ;;  %p1280_p3 = scmp.lt.s32.totalorder %s1274_s5, %s1274_s5 }
  0x61   :  { %p1281_p4 = por %p1280_p3, %p1279_p2 }
  0x63   :  { %p1282_p5 = pnand %p1281_p4, %p1275_p1 }
  0x65   :  { %1285 = shalt.err (!%p1282_p5)
}
  0x66   :  { %51 = dma.hbm_to_vmem [thread:$0]  %s1592_s2, 32, %s49_s18, [#allocation6]  }
  0x67   :  { %s1396_s20 = smov [#allocation10]   ;;  %s1397_s15 = smov [#allocation13]  }
  0x68   :  { %s70_s26 = sshll.u32 %s1396_s20, 4  ;;  %s92_s16 = sshll.u32 %s1397_s15, 4  ;;  %s71_s26 = int_to_ptr.vmem [resolvable:$true] %s70_s26  ;;  %s93_s16 = int_to_ptr.vmem [resolvable:$true] %s92_s16 }
  0x69   :  { %s1286_s22 = scalar_lea.hbm %s1594_s4, 32 }
  0x6a   :  { %p1287_p6 = scmp.ne.s32.totalorder %s1594_s4, %s1286_s22  ;;  %p1290_p7 = scmp.lt.u32.totalorder %s1286_s22, %s1594_s4 }
  0x6c   :  { %p1292_p8 = pnand %p1290_p7, %p1287_p6 }
  0x6e   :  { %1295 = shalt.err (!%p1292_p8)
}
  0x6f   :  { %s1296_s2 = scalar_lea.vmem %s71_s26, 32  ;;  %p1301_p10 = scmp.lt.s32.totalorder %s71_s26, %s71_s26 }
  0x70   :  { %p1297_p9 = scmp.ne.s32.totalorder %s71_s26, %s1296_s2  ;;  %p1302_p11 = scmp.lt.s32.totalorder %s1296_s2, %s1296_s2 }
  0x72   :  { %p1303_p12 = por %p1302_p11, %p1301_p10 }
  0x74   :  { %p1304_p13 = pnand %p1303_p12, %p1297_p9 }
  0x76   :  { %1307 = shalt.err (!%p1304_p13)
}
  0x77   :  { %73 = dma.hbm_to_vmem [thread:$0]  %s1594_s4, 32, %s71_s26, [#allocation9]  }
  0x78   :  { %s1308_s29 = scalar_lea.hbm %s1596_s6, 32 }
  0x79   :  { %p1309_p0 = scmp.ne.s32.totalorder %s1596_s6, %s1308_s29  ;;  %p1312_p1 = scmp.lt.u32.totalorder %s1308_s29, %s1596_s6 }
  0x7b   :  { %p1314_p2 = pnand %p1312_p1, %p1309_p0 }
  0x7d   :  { %1317 = shalt.err (!%p1314_p2)
}
  0x7e   :  { %s1318_s1 = scalar_lea.vmem %s93_s16, 32  ;;  %p1323_p4 = scmp.lt.s32.totalorder %s93_s16, %s93_s16 }
  0x7f   :  { %p1319_p3 = scmp.ne.s32.totalorder %s93_s16, %s1318_s1  ;;  %p1324_p5 = scmp.lt.s32.totalorder %s1318_s1, %s1318_s1 }
  0x81   :  { %p1325_p6 = por %p1324_p5, %p1323_p4 }
  0x83   :  { %p1326_p7 = pnand %p1325_p6, %p1319_p3 }
  0x85   :  { %1329 = shalt.err (!%p1326_p7)
}
  0x86   :  { %95 = dma.hbm_to_vmem [thread:$0]  %s1596_s6, 32, %s93_s16, [#allocation12]  }
  0x87   :  { %s1398_s14 = smov [#allocation16]   ;;  %s1330_s20 = scalar_lea.hbm %s1598_s8, 16 }
  0x88   :  { %s114_s5 = sshll.u32 %s1398_s14, 4  ;;  %p1331_p8 = scmp.ne.s32.totalorder %s1598_s8, %s1330_s20  ;;  %s115_s5 = int_to_ptr.vmem [resolvable:$true] %s114_s5 }
  0x89   :  { %p1334_p9 = scmp.lt.u32.totalorder %s1330_s20, %s1598_s8 }
  0x8b   :  { %p1336_p10 = pnand %p1334_p9, %p1331_p8 }
  0x8d   :  { %1339 = shalt.err (!%p1336_p10)
}
  0x8e   :  { %s1340_s22 = scalar_lea.vmem %s115_s5, 16  ;;  %s1344_s6 = scalar_lea.vmem %s115_s5, 32 }
  0x8f   :  { %p1341_p11 = scmp.ne.s32.totalorder %s115_s5, %s1340_s22  ;;  %p1345_p12 = scmp.lt.s32.totalorder %s115_s5, %s115_s5 }
  0x90   :  { %p1346_p13 = scmp.lt.s32.totalorder %s1344_s6, %s1340_s22 }
  0x92   :  { %p1347_p0 = por %p1346_p13, %p1345_p12 }
  0x94   :  { %p1348_p1 = pnand %p1347_p0, %p1341_p11 }
  0x96   :  { %1351 = shalt.err (!%p1348_p1)
}
  0x97   :  { %117 = dma.hbm_to_vmem [thread:$0]  %s1598_s8, 16, %s115_s5, [#allocation15]  }
  0x98   :  { %1374 = dma.done.wait [#allocation3], 128  }
  0x99   :  { %1375 = vsyncadd [#allocation3], 4294967168 }
  0x9a   :  { %1376 = dma.done.wait [#allocation6], 288  }
  0x9b   :  { %1377 = vsyncadd [#allocation6], 4294967008 }
  0x9c   :  { %1378 = dma.done.wait [#allocation9], 4128  }
  0x9d   :  { %1379 = vsyncadd [#allocation9], 4294963168 }
  0x9e   :  { %1380 = dma.done.wait [#allocation12], 4128  }
  0x9f   :  { %1381 = vsyncadd [#allocation12], 4294963168 }
  0xa0   :  { %1382 = dma.done.wait [#allocation15], 2064  }
  0xa1   :  { %1383 = vsyncadd [#allocation15], 4294965232  ;;  %v1399_v0 = vmov 0   ;;  %v1037_v1 = vld [vmem:[#allocation5 + $0x4] ss:$8 sps:$4 sm:$0xff]   ;;  %v146_v3 = vld [vmem:[#allocation2] sm:$0xff] }
  0xa2   :  { %208 = vmatprep.mubr.bf16.mxu0 %v1399_v0  ;;  %v1039_v2 = vld [vmem:[#allocation5] ss:$8 sps:$4 sm:$0xff]   ;;  %176 = vmatprep.subr.bf16.mxu0 %v1037_v1  ;;  %v147_v4 = vpack.c.bf16 %v146_v3, %v146_v3  ;;  %v1042_v6 = vld [vmem:[#allocation8] ss:$8 sps:$4 sm:$0xff]   ;;  %vm172_vm0 = vcmask 130048   ;;  %v152_v1 = vlaneseq  ;;  %s1400_s8 = smov [#allocation17]  }
  0xa3   :  { %v1040_v5 = vld [vmem:[#allocation8 + $0x4] ss:$8 sps:$4 sm:$0xff]   ;;  %177 = vmatpush1.bf16.msra.mxu0 %v1039_v2  ;;  %v1043_v7 = vld [vmem:[#allocation8 + $0x14] ss:$8 sps:$4 sm:$0xff]   ;;  %v1045_v8 = vld [vmem:[#allocation8 + $0x10] ss:$8 sps:$4 sm:$0xff]  }
  0xa4   :  { %425 = vmatprep.subr.bf16.mxu1 %v1040_v5  ;;  %v1046_v9 = vld [vmem:[#allocation8 + $0x24] ss:$8 sps:$4 sm:$0xff]   ;;  %v1048_v10 = vld [vmem:[#allocation8 + $0x20] ss:$8 sps:$4 sm:$0xff]   ;;  %v1049_v11 = vld [vmem:[#allocation8 + $0x34] ss:$8 sps:$4 sm:$0xff]  }
  0xa5   :  { %426 = vmatpush1.bf16.msra.mxu1 %v1042_v6  ;;  %v1051_v12 = vld [vmem:[#allocation8 + $0x30] ss:$8 sps:$4 sm:$0xff]   ;;  %v1052_v13 = vld [vmem:[#allocation8 + $0x44] ss:$8 sps:$4 sm:$0xff]   ;;  %v1054_v14 = vld [vmem:[#allocation8 + $0x40] ss:$8 sps:$4 sm:$0xff]  }
  0xa6   :  { %918 = vmatmul.mubr.msk.bf16.vlgmr.msra.gmra.mrb[0].mxu0 %vm172_vm0, %v147_v4  ;;  %427 = vmatprep.subr.bf16.mxu1 %v1043_v7  ;;  %v1055_v15 = vld [vmem:[#allocation8 + $0x54] ss:$8 sps:$4 sm:$0xff]   ;;  %v1057_v16 = vld [vmem:[#allocation8 + $0x50] ss:$8 sps:$4 sm:$0xff]   ;;  %v1058_v17 = vld [vmem:[#allocation8 + $0x64] ss:$8 sps:$4 sm:$0xff]  }
  0xa7   :  { %v1060_v18 = vld [vmem:[#allocation8 + $0x60] ss:$8 sps:$4 sm:$0xff]   ;;  %v1061_v19 = vld [vmem:[#allocation8 + $0x74] ss:$8 sps:$4 sm:$0xff]   ;;  %v1063_v20 = vld [vmem:[#allocation8 + $0x70] ss:$8 sps:$4 sm:$0xff]  }
  0xa8   :  { %v1064_v21 = vld [vmem:[#allocation8 + $0x84] ss:$8 sps:$4 sm:$0xff]   ;;  %v1066_v22 = vld [vmem:[#allocation8 + $0x80] ss:$8 sps:$4 sm:$0xff]   ;;  %v1067_v23 = vld [vmem:[#allocation8 + $0x94] ss:$8 sps:$4 sm:$0xff]  }
  0xa9   :  { %428 = vmatpush1.bf16.msra.mxu1 %v1045_v8  ;;  %v1069_v24 = vld [vmem:[#allocation8 + $0x90] ss:$8 sps:$4 sm:$0xff]   ;;  %v1070_v25 = vld [vmem:[#allocation8 + $0xa4] ss:$8 sps:$4 sm:$0xff]   ;;  %v1072_v26 = vld [vmem:[#allocation8 + $0xa0] ss:$8 sps:$4 sm:$0xff]  }
  0xaa   :  { %429 = vmatprep.subr.bf16.mxu1 %v1046_v9  ;;  %v1073_v27 = vld [vmem:[#allocation8 + $0xb4] ss:$8 sps:$4 sm:$0xff]   ;;  %v1075_v28 = vld [vmem:[#allocation8 + $0xb0] ss:$8 sps:$4 sm:$0xff]   ;;  %v1076_v29 = vld [vmem:[#allocation8 + $0xc4] ss:$8 sps:$4 sm:$0xff]  }
  0xab   :  { %v1078_v30 = vld [vmem:[#allocation8 + $0xc0] ss:$8 sps:$4 sm:$0xff]   ;;  %v1079_v31 = vld [vmem:[#allocation8 + $0xd4] ss:$8 sps:$4 sm:$0xff]   ;;  %v1081_v32 = vld [vmem:[#allocation8 + $0xd0] ss:$8 sps:$4 sm:$0xff]  }
  0xac   :  { %v1082_v33 = vld [vmem:[#allocation8 + $0xe4] ss:$8 sps:$4 sm:$0xff]   ;;  %v1084_v34 = vld [vmem:[#allocation8 + $0xe0] ss:$8 sps:$4 sm:$0xff]   ;;  %v1085_v35 = vld [vmem:[#allocation8 + $0xf4] ss:$8 sps:$4 sm:$0xff]  }
  0xad   :  { %430 = vmatpush1.bf16.msra.mxu1 %v1048_v10  ;;  %v1087_v36 = vld [vmem:[#allocation8 + $0xf0] ss:$8 sps:$4 sm:$0xff]   ;;  %v1088_v37 = vld [vmem:[#allocation11] ss:$8 sps:$4 sm:$0xff]   ;;  %v153_v2 = vshrl.u32 %v152_v1, 7  ;;  %s903_s25 = sshll.u32 %s1400_s8, 4  ;;  %s904_s25 = int_to_ptr.vmem [resolvable:$true] %s903_s25 }
  0xae   :  { %431 = vmatprep.subr.bf16.mxu1 %v1049_v11  ;;  %v1090_v38 = vld [vmem:[#allocation11 + $0x4] ss:$8 sps:$4 sm:$0xff]   ;;  %v1093_v39 = vld [vmem:[#allocation11 + $0x14] ss:$8 sps:$4 sm:$0xff]   ;;  %v1091_v40 = vld [vmem:[#allocation11 + $0x10] ss:$8 sps:$4 sm:$0xff]   ;;  %p1357_p3 = scmp.lt.s32.totalorder %s904_s25, %s904_s25 }
  0xaf   :  { %674 = vmatprep.subr.bf16.mxu0 %v1090_v38  ;;  %v1096_v41 = vld [vmem:[#allocation11 + $0x24] ss:$8 sps:$4 sm:$0xff]   ;;  %v1094_v42 = vld [vmem:[#allocation11 + $0x20] ss:$8 sps:$4 sm:$0xff]   ;;  %v1099_v43 = vld [vmem:[#allocation11 + $0x34] ss:$8 sps:$4 sm:$0xff]  }
  0xb0   :  { %675 = vmatpush1.bf16.msra.mxu0 %v1088_v37  ;;  %v1097_v44 = vld [vmem:[#allocation11 + $0x30] ss:$8 sps:$4 sm:$0xff]   ;;  %v1102_v45 = vld [vmem:[#allocation11 + $0x44] ss:$8 sps:$4 sm:$0xff]   ;;  %v1100_v46 = vld [vmem:[#allocation11 + $0x40] ss:$8 sps:$4 sm:$0xff]  }
  0xb1   :  { %432 = vmatpush1.bf16.msra.mxu1 %v1051_v12  ;;  %676 = vmatprep.subr.bf16.mxu0 %v1093_v39  ;;  %v1105_v47 = vld [vmem:[#allocation11 + $0x54] ss:$8 sps:$4 sm:$0xff]   ;;  %v1103_v48 = vld [vmem:[#allocation11 + $0x50] ss:$8 sps:$4 sm:$0xff]   ;;  %v1108_v49 = vld [vmem:[#allocation11 + $0x64] ss:$8 sps:$4 sm:$0xff]  }
  0xb2   :  { %433 = vmatprep.subr.bf16.mxu1 %v1052_v13  ;;  %v1106_v50 = vld [vmem:[#allocation11 + $0x60] ss:$8 sps:$4 sm:$0xff]   ;;  %v1111_v51 = vld [vmem:[#allocation11 + $0x74] ss:$8 sps:$4 sm:$0xff]   ;;  %v1109_v52 = vld [vmem:[#allocation11 + $0x70] ss:$8 sps:$4 sm:$0xff]  }
  0xb3   :  { %v1114_v53 = vld [vmem:[#allocation11 + $0x84] ss:$8 sps:$4 sm:$0xff]   ;;  %v1112_v54 = vld [vmem:[#allocation11 + $0x80] ss:$8 sps:$4 sm:$0xff]   ;;  %v1117_v55 = vld [vmem:[#allocation11 + $0x94] ss:$8 sps:$4 sm:$0xff]  }
  0xb4   :  { %677 = vmatpush1.bf16.msra.mxu0 %v1091_v40  ;;  %v1115_v56 = vld [vmem:[#allocation11 + $0x90] ss:$8 sps:$4 sm:$0xff]   ;;  %v1120_v57 = vld [vmem:[#allocation11 + $0xa4] ss:$8 sps:$4 sm:$0xff]   ;;  %v1118_v58 = vld [vmem:[#allocation11 + $0xa0] ss:$8 sps:$4 sm:$0xff]  }
  0xb5   :  { %434 = vmatpush1.bf16.msra.mxu1 %v1054_v14  ;;  %678 = vmatprep.subr.bf16.mxu0 %v1096_v41  ;;  %v1123_v59 = vld [vmem:[#allocation11 + $0xb4] ss:$8 sps:$4 sm:$0xff]   ;;  %v1121_v60 = vld [vmem:[#allocation11 + $0xb0] ss:$8 sps:$4 sm:$0xff]   ;;  %v1126_v61 = vld [vmem:[#allocation11 + $0xc4] ss:$8 sps:$4 sm:$0xff]  }
  0xb6   :  { %435 = vmatprep.subr.bf16.mxu1 %v1055_v15  ;;  %v1124_v62 = vld [vmem:[#allocation11 + $0xc0] ss:$8 sps:$4 sm:$0xff]   ;;  %v1129_v63 = vld [vmem:[#allocation11 + $0xd4] ss:$8 sps:$4 sm:$0xff]   ;;  %v1127_v0 = vld [vmem:[#allocation11 + $0xd0] ss:$8 sps:$4 sm:$0xff]  }
  0xb7   :  { %v1568_v3 = vsub.s32 0, %v153_v2  ;;  %v150_v4 = vld [vmem:[#allocation7] sm:$0x3]  ;;  %v1570_v5 = vsub.s32 1, %v153_v2  ;;  %v983_v1 = vld [vmem:[#allocation16] ss:$0 sm:$0xff] }
  0xb8   :  { %679 = vmatpush1.bf16.msra.mxu0 %v1094_v42  ;;  %vm895_vm1 = vcmask 31744   ;;  %s1352_s3 = scalar_lea.vmem %s904_s25, 128 }
  0xb9   :  { %436 = vmatpush1.bf16.msra.mxu1 %v1057_v16  ;;  %680 = vmatprep.subr.bf16.mxu0 %v1099_v43  ;;  %v155_v6 = vrot.slane %v150_v4, %v1568_v3  ;;  %v159_v7 = vrot.slane %v150_v4, %v1570_v5  ;;  %p1353_p2 = scmp.ne.s32.totalorder %s904_s25, %s1352_s3  ;;  %p1358_p4 = scmp.lt.s32.totalorder %s1352_s3, %s1352_s3 }
  0xba   :  { %437 = vmatprep.subr.bf16.mxu1 %v1058_v17 }
  0xbb   :  { %p1359_p5 = por %p1358_p4, %p1357_p3 }
  0xbc   :  { %681 = vmatpush1.bf16.msra.mxu0 %v1097_v44 }
  0xbd   :  { %438 = vmatpush1.bf16.msra.mxu1 %v1060_v18  ;;  %682 = vmatprep.subr.bf16.mxu0 %v1102_v45  ;;  %v1132_v18 = vld [vmem:[#allocation11 + $0xe4] ss:$8 sps:$4 sm:$0xff]   ;;  %p1360_p6 = pnand %p1359_p5, %p1353_p2 }
  0xbe   :  { %439 = vmatprep.subr.bf16.mxu1 %v1061_v19  ;;  %v1130_v19 = vld [vmem:[#allocation11 + $0xe0] ss:$8 sps:$4 sm:$0xff]  }
  0xc0   :  { %683 = vmatpush1.bf16.msra.mxu0 %v1100_v46 }
  0xc1   :  { %440 = vmatpush1.bf16.msra.mxu1 %v1063_v20  ;;  %684 = vmatprep.subr.bf16.mxu0 %v1105_v47  ;;  %v1135_v20 = vld [vmem:[#allocation11 + $0xf4] ss:$8 sps:$4 sm:$0xff]  }
  0xc2   :  { %441 = vmatprep.subr.bf16.mxu1 %v1064_v21  ;;  %v1133_v21 = vld [vmem:[#allocation11 + $0xf0] ss:$8 sps:$4 sm:$0xff]  }
  0xc3   :  { %v1148_v47 = vld [vmem:[#allocation14 + $0x70] sm:$0xff]  }
  0xc4   :  { %685 = vmatpush1.bf16.msra.mxu0 %v1103_v48  ;;  %v1149_v48 = vld [vmem:[#allocation14 + $0x30] sm:$0xff]  }
  0xc5   :  { %442 = vmatpush1.bf16.msra.mxu1 %v1066_v22  ;;  %686 = vmatprep.subr.bf16.mxu0 %v1108_v49  ;;  %v1136_v22 = vld [vmem:[#allocation14 + $0x40] sm:$0xff]   ;;  %v1150_v49 = vld [vmem:[#allocation14 + $0x78] sm:$0xff]  }
  0xc6   :  { %443 = vmatprep.subr.bf16.mxu1 %v1067_v23  ;;  %v1137_v23 = vld [vmem:[#allocation14] sm:$0xff]  }
  0xc8   :  { %687 = vmatpush1.bf16.msra.mxu0 %v1106_v50  ;;  %v1151_v50 = vld [vmem:[#allocation14 + $0x38] sm:$0xff]  }
  0xc9   :  { %444 = vmatpush1.bf16.msra.mxu1 %v1069_v24  ;;  %688 = vmatprep.subr.bf16.mxu0 %v1111_v51  ;;  %v1138_v24 = vld [vmem:[#allocation14 + $0x48] sm:$0xff]   ;;  %v502_v51 = vld [vmem:[#allocation13] sm:$0x3] }
  0xca   :  { %445 = vmatprep.subr.bf16.mxu1 %v1070_v25  ;;  %v1139_v25 = vld [vmem:[#allocation14 + $0x8] sm:$0xff]  }
  0xcc   :  { %689 = vmatpush1.bf16.msra.mxu0 %v1109_v52  ;;  %v507_v52 = vrot.slane %v502_v51, %v1568_v3 }
  0xcd   :  { %446 = vmatpush1.bf16.msra.mxu1 %v1072_v26  ;;  %690 = vmatprep.subr.bf16.mxu0 %v1114_v53  ;;  %v1140_v26 = vld [vmem:[#allocation14 + $0x50] sm:$0xff]   ;;  %v511_v53 = vrot.slane %v502_v51, %v1570_v5 }
  0xce   :  { %447 = vmatprep.subr.bf16.mxu1 %v1073_v27  ;;  %v1141_v27 = vld [vmem:[#allocation14 + $0x10] sm:$0xff]  }
  0xd0   :  { %691 = vmatpush1.bf16.msra.mxu0 %v1112_v54 }
  0xd1   :  { %448 = vmatpush1.bf16.msra.mxu1 %v1075_v28  ;;  %692 = vmatprep.subr.bf16.mxu0 %v1117_v55  ;;  %v1142_v28 = vld [vmem:[#allocation14 + $0x58] sm:$0xff]  }
  0xd2   :  { %449 = vmatprep.subr.bf16.mxu1 %v1076_v29  ;;  %v1143_v29 = vld [vmem:[#allocation14 + $0x18] sm:$0xff]  }
  0xd4   :  { %693 = vmatpush1.bf16.msra.mxu0 %v1115_v56 }
  0xd5   :  { %450 = vmatpush1.bf16.msra.mxu1 %v1078_v30  ;;  %694 = vmatprep.subr.bf16.mxu0 %v1120_v57  ;;  %v1144_v30 = vld [vmem:[#allocation14 + $0x60] sm:$0xff]  }
  0xd6   :  { %451 = vmatprep.subr.bf16.mxu1 %v1079_v31  ;;  %v1145_v31 = vld [vmem:[#allocation14 + $0x20] sm:$0xff]  }
  0xd8   :  { %695 = vmatpush1.bf16.msra.mxu0 %v1118_v58 }
  0xd9   :  { %452 = vmatpush1.bf16.msra.mxu1 %v1081_v32  ;;  %696 = vmatprep.subr.bf16.mxu0 %v1123_v59  ;;  %v1146_v32 = vld [vmem:[#allocation14 + $0x68] sm:$0xff]  }
  0xda   :  { %453 = vmatprep.subr.bf16.mxu1 %v1082_v33  ;;  %v1147_v33 = vld [vmem:[#allocation14 + $0x28] sm:$0xff]  }
  0xdc   :  { %697 = vmatpush1.bf16.msra.mxu0 %v1121_v60 }
  0xdd   :  { %454 = vmatpush1.bf16.msra.mxu1 %v1084_v34  ;;  %698 = vmatprep.subr.bf16.mxu0 %v1126_v61  ;;  %v253_v34 = vld [vmem:[#allocation10] sm:$0x3] }
  0xde   :  { %455 = vmatprep.subr.bf16.mxu1 %v1085_v35  ;;  %v258_v35 = vrot.slane %v253_v34, %v1568_v3 }
  0xe0   :  { %699 = vmatpush1.bf16.msra.mxu0 %v1124_v62 }
  0xe1   :  { %456 = vmatpush1.bf16.msra.mxu1 %v1087_v36  ;;  %700 = vmatprep.subr.bf16.mxu0 %v1129_v63  ;;  %v262_v36 = vrot.slane %v253_v34, %v1570_v5 }
  0xe2   :  { %1000 = vmatprep.subr.bf16.mxu1 %v1136_v22 }
  0xe4   :  { %701 = vmatpush1.bf16.msra.mxu0 %v1127_v0 }
  0xe5   :  { %702 = vmatprep.subr.bf16.mxu0 %v1132_v18 }
  0xe8   :  { %703 = vmatpush1.bf16.msra.mxu0 %v1130_v19 }
  0xe9   :  { %704 = vmatprep.subr.bf16.mxu0 %v1135_v20 }
  0xec   :  { %705 = vmatpush1.bf16.msra.mxu0 %v1133_v21 }
 0x179   :  { %v210_v8 = vpop.f32.mrb[0].mxu0 }
 0x17a   :  { %v211_v9 = vadd.f32 %v210_v8, %v155_v6  ;;  %v212_v10 = vpop.f32.mrb[1].mxu0 }
 0x17b   :  { %v213_v11 = vadd.f32 %v212_v10, %v159_v7  ;;  %v214_v12 = vpop.f32.mrb[2].mxu0 }
 0x17c   :  { %v217_v13 = vmax.f32 %v211_v9, 0.0  ;;  %v215_v14 = vpop.f32.mrb[3].mxu0 }
 0x17d   :  { %v218_v15 = vmax.f32 %v213_v11, 0.0 }
 0x17e   :  { %v219_v17 = vpack.c.bf16 %v217_v13, %v217_v13 }
 0x17f   :  { %v220_v16 = vpack.c.bf16 %v218_v15, %v218_v15 }
 0x181   :  { %457 = vmatprep.mubr.bf16.mxu1 %v220_v16 }
 0x182   :  { %458 = vmatmul.mubr.bf16.vlgmr.msra.gmra.mrb[0].mxu1 %v219_v17 }
 0x183   :  { %1001 = vmatpush3.bf16.msra.mxu1 %v1137_v23 }
 0x184   :  { %1002 = vmatprep.subr.bf16.mxu1 %v1138_v24 }
 0x187   :  { %1003 = vmatpush3.bf16.msra.mxu1 %v1139_v25 }
 0x188   :  { %1004 = vmatprep.subr.bf16.mxu1 %v1140_v26 }
 0x18b   :  { %1005 = vmatpush3.bf16.msra.mxu1 %v1141_v27 }
 0x18c   :  { %1006 = vmatprep.subr.bf16.mxu1 %v1142_v28 }
 0x18f   :  { %1007 = vmatpush3.bf16.msra.mxu1 %v1143_v29 }
 0x190   :  { %1008 = vmatprep.subr.bf16.mxu1 %v1144_v30 }
 0x193   :  { %1009 = vmatpush3.bf16.msra.mxu1 %v1145_v31 }
 0x194   :  { %1010 = vmatprep.subr.bf16.mxu1 %v1146_v32 }
 0x197   :  { %1011 = vmatpush3.bf16.msra.mxu1 %v1147_v33 }
 0x198   :  { %1012 = vmatprep.subr.bf16.mxu1 %v1148_v47 }
 0x19b   :  { %1013 = vmatpush3.bf16.msra.mxu1 %v1149_v48 }
 0x19c   :  { %1014 = vmatprep.subr.bf16.mxu1 %v1150_v49 }
 0x19f   :  { %1015 = vmatpush3.bf16.msra.mxu1 %v1151_v50 }
 0x255   :  { %v459_v37 = vpop.f32.mrb[0].mxu1 }
 0x256   :  { %v460_v38 = vadd.f32 %v459_v37, %v258_v35  ;;  %v461_v39 = vpop.f32.mrb[1].mxu1 }
 0x257   :  { %v462_v40 = vadd.f32 %v461_v39, %v262_v36  ;;  %v463_v41 = vpop.f32.mrb[2].mxu1 }
 0x258   :  { %v466_v42 = vmax.f32 %v460_v38, 0.0  ;;  %v464_v43 = vpop.f32.mrb[3].mxu1 }
 0x259   :  { %v467_v44 = vmax.f32 %v462_v40, 0.0 }
 0x25a   :  { %v468_v46 = vpack.c.bf16 %v466_v42, %v466_v42 }
 0x25b   :  { %v469_v45 = vpack.c.bf16 %v467_v44, %v467_v44 }
 0x25d   :  { %706 = vmatprep.mubr.bf16.mxu0 %v469_v45 }
 0x25e   :  { %707 = vmatmul.mubr.bf16.vlgmr.msra.gmra.mrb[4].mxu0 %v468_v46 }
 0x331   :  { %v708_v54 = vpop.f32.mrb[4].mxu0 }
 0x332   :  { %v709_v55 = vadd.f32 %v708_v54, %v507_v52  ;;  %v710_v56 = vpop.f32.mrb[5].mxu0 }
 0x333   :  { %v711_v57 = vadd.f32 %v710_v56, %v511_v53  ;;  %v712_v58 = vpop.f32.mrb[6].mxu0 }
 0x334   :  { %v715_v59 = vmax.f32 %v709_v55, 0.0  ;;  %v713_v60 = vpop.f32.mrb[7].mxu0 }
 0x335   :  { %v716_v61 = vmax.f32 %v711_v57, 0.0 }
 0x336   :  { %v717_v63 = vpack.c.bf16 %v715_v59, %v715_v59 }
 0x337   :  { %v718_v62 = vpack.c.bf16 %v716_v61, %v716_v61 }
 0x339   :  { %886 = vmatprep.mubr.bf16.mxu1 %v718_v62 }
 0x33a   :  { %887 = vmatmul.mubr.bf16.vlgmr.msra.gmra.mrb[4].mxu1 %v717_v63 }
 0x40d   :  { %v1016_v0 = vpop.f32.mrb[4].mxu1 }
 0x40e   :  { %v1017_v2 = vpop.f32.mrb[5].mxu1 }
 0x40f   :  { %v1018_v4 = vadd.f32 %v1017_v2, %v1016_v0  ;;  %v1019_v6 = vpop.f32.mrb[6].mxu1 }
 0x410   :  { %v1020_v3 = vpop.f32.mrb[7].mxu1 }
 0x411   :  { %v889_v7 = vadd.f32 %v1018_v4, %v983_v1 }
 0x413   :  { %1152 = vtanh.f32 %v889_v7 }
 0x41d   :  { %v1153_v5 = vpop.eup %1152 }
 0x41e   :  { %896 = vst.msk [vmem:[#allocation17] sm:$0xff] %vm895_vm1, %v1153_v5 }
 0x41f   :  { %1363 = shalt.err (!%p1360_p6)
}
 0x420   :  { %s1364_s18 = scalar_lea.hbm %s1599_s9, 128 }
 0x421   :  { %p1365_p7 = scmp.ne.s32.totalorder %s1599_s9, %s1364_s18  ;;  %p1368_p8 = scmp.lt.u32.totalorder %s1364_s18, %s1599_s9 }
 0x423   :  { %p1370_p9 = pnand %p1368_p8, %p1365_p7 }
 0x425   :  { %1373 = shalt.err (!%p1370_p9)
}
 0x426   :  { %906 = dma.vmem_to_hbm [thread:$0]  %s904_s25, 128, %s1599_s9, [#allocation4]  }
 0x427   :  { %1384 = dma.done.wait [#allocation4], 128  }
 0x428   :  { %1385 = vsyncadd [#allocation4], 4294967168 }
 0x429   :  { %910 = vsyncpa [#allocation3], 1 }
 0x42a   :  { %911 = vsyncpa [#allocation6], 1 }
 0x42b   :  { %912 = vsyncpa [#allocation9], 1 }
 0x42c   :  { %913 = vsyncpa [#allocation12], 1 }
 0x42d   :  { %914 = vsyncpa [#allocation15], 1 }
 0x42e   :  { %915 = vsyncpa [#allocation4], 1 }

</bundles_post_ra>
